<compile_context>
chip_gen: v6e
topology: v6e:2x2x1
jax: 0.10.0
libtpu: 0.0.40
codegen_flags: <defaults>
</compile_context>

<pallas_src>
import functools

import jax
import jax.numpy as jnp
from jax.experimental import pallas as pl
from jax.experimental.pallas import tpu as pltpu

LANE = 128  # TPU lane width; all feature dims are padded to a multiple of this.


def _round_up(n, m):
    return ((n + m - 1) // m) * m


def _pad2d(a, rows, cols):
    """Zero-pad a 2-D array up to (rows, cols)."""
    return jnp.pad(a, ((0, rows - a.shape[0]), (0, cols - a.shape[1])))


def mlp_kernel(x_ref, w1_ref, b1_ref, w2_ref, b2_ref, w3_ref, b3_ref,
               w4_ref, b4_ref, o_ref):
    """One (TM, 128) batch tile of the whole forward pass; everything lane-dense."""
    cdt = w1_ref.dtype                       # matmul-input dtype (f32 or bf16)
    x = x_ref[...].astype(cdt)

    # Layer 1: Linear + ReLU  (accumulate in f32, activation math in f32)
    h = jnp.dot(x, w1_ref[...], preferred_element_type=jnp.float32) + b1_ref[...]
    h = jnp.maximum(h, 0.0).astype(cdt)

    # Layer 2: Linear + ReLU
    h = jnp.dot(h, w2_ref[...], preferred_element_type=jnp.float32) + b2_ref[...]
    h = jnp.maximum(h, 0.0).astype(cdt)

    # Layer 3: Linear + ReLU
    h = jnp.dot(h, w3_ref[...], preferred_element_type=jnp.float32) + b3_ref[...]
    h = jnp.maximum(h, 0.0).astype(cdt)

    # Layer 4: Linear + Sigmoid (padded to 128 output lanes -> unmasked store;
    # the single real column is sliced off in the wrapper).
    h = jnp.dot(h, w4_ref[...], preferred_element_type=jnp.float32) + b4_ref[...]
    o_ref[...] = jax.nn.sigmoid(h)


@functools.partial(jax.jit, static_argnames=("tile_m", "compute_dtype"))
def mlp_forward(x, params, *, tile_m=256, compute_dtype=jnp.float32):
    (w1, b1), (w2, b2), (w3, b3), (w4, b4) = params
    batch, in_dim = x.shape
    out_dim = w4.shape[1]

    # Padded (lane-dense) feature dims.
    in_p = _round_up(in_dim, LANE)
    h1_p = _round_up(w1.shape[1], LANE)
    h2_p = _round_up(w2.shape[1], LANE)
    h3_p = _round_up(w3.shape[1], LANE)
    out_p = _round_up(out_dim, LANE)

    # Batch tile: multiple of 8 (f32 sublane), capped at tile_m; pad batch up to a
    # whole number of tiles so the grid divides evenly.
    tm = min(tile_m, _round_up(batch, 8))
    batch_p = _round_up(batch, tm)
    grid = (batch_p // tm,)

    # Zero-padding keeps results exact: padded input cols hit zero weight rows,
    # padded output cols get 0*x + 0 bias and ReLU keeps them at 0.
    xp = _pad2d(x, batch_p, in_p).astype(compute_dtype)
    w1p = _pad2d(w1, in_p, h1_p).astype(compute_dtype)
    w2p = _pad2d(w2, h1_p, h2_p).astype(compute_dtype)
    w3p = _pad2d(w3, h2_p, h3_p).astype(compute_dtype)
    w4p = _pad2d(w4, h3_p, out_p).astype(compute_dtype)
    # Biases stay f32 (added to the f32 accumulator).
    b1p = _pad2d(b1.reshape(1, -1).astype(jnp.float32), 1, h1_p)
    b2p = _pad2d(b2.reshape(1, -1).astype(jnp.float32), 1, h2_p)
    b3p = _pad2d(b3.reshape(1, -1).astype(jnp.float32), 1, h3_p)
    b4p = _pad2d(b4.reshape(1, -1).astype(jnp.float32), 1, out_p)

    def _resident(rows, cols):
        # Full-array block with a constant index map -> stays VMEM-resident across
        # all grid iterations (no re-DMA of weights/biases per batch tile).
        return pl.BlockSpec((rows, cols), lambda i: (0, 0))

    out = pl.pallas_call(
        mlp_kernel,
        out_shape=jax.ShapeDtypeStruct((batch_p, out_p), jnp.float32),
        grid=grid,
        in_specs=[
            pl.BlockSpec((tm, in_p), lambda i: (i, 0)),       # x: tiled over batch
            _resident(in_p, h1_p), _resident(1, h1_p),        # W1, b1
            _resident(h1_p, h2_p), _resident(1, h2_p),        # W2, b2
            _resident(h2_p, h3_p), _resident(1, h3_p),        # W3, b3
            _resident(h3_p, out_p), _resident(1, out_p),      # W4, b4
        ],
        out_specs=pl.BlockSpec((tm, out_p), lambda i: (i, 0)),
        compiler_params=pltpu.CompilerParams(
            dimension_semantics=("parallel",)),               # megacore-shard the batch axis
    )(xp, w1p, b1p, w2p, b2p, w3p, b3p, w4p, b4p)

    # Drop batch padding and padded output lanes (only column 0 is the real logit).
    return out[:batch, :out_dim]


def init_linear(key, fan_in, fan_out):
    # Deterministic init mimicking PyTorch's default uniform(-1/sqrt(fan_in), 1/sqrt(fan_in)).
    kw, kb = jax.random.split(key)
    bound = 1.0 / jnp.sqrt(jnp.float32(fan_in))
    w = jax.random.uniform(kw, (fan_in, fan_out), jnp.float32, -bound, bound)
    b = jax.random.uniform(kb, (1, fan_out), jnp.float32, -bound, bound)
    return w, b


def ref_forward(x, params):
    (w1, b1), (w2, b2), (w3, b3), (w4, b4) = params
    h = jnp.maximum(x @ w1 + b1, 0.0)
    h = jnp.maximum(h @ w2 + b2, 0.0)
    h = jnp.maximum(h @ w3 + b3, 0.0)
    return jax.nn.sigmoid(h @ w4 + b4)


if __name__ == "__main__":
    # breast-cancer dataset has 30 features; binary classification -> output_dim = 1
    input_dim, output_dim = 30, 1

    key = jax.random.PRNGKey(0)
    kx, k1, k2, k3, k4 = jax.random.split(key, 5)

    params = (
        init_linear(k1, input_dim, 64),
        init_linear(k2, 64, 32),
        init_linear(k3, 32, 16),
        init_linear(k4, 16, output_dim),
    )

    # Check the tiny-batch path and a batch that is not a multiple of the tile.
    for batch in (8, 300):
        xkey = jax.random.fold_in(kx, batch)
        x = jax.random.normal(xkey, (batch, input_dim), jnp.float32)

        out = mlp_forward(x, params, tile_m=256)
        jax.block_until_ready(out)

        expected = ref_forward(x, params)
        assert out.shape == (batch, output_dim)
        assert jnp.allclose(out, expected, atol=1e-5), f"f32 mismatch at batch={batch}"

    # bf16 matmul-input path (f32 accumulation) -- the v6e/v7x MXU-rate optimization.
    xb = jax.random.normal(jax.random.fold_in(kx, 512), (512, input_dim), jnp.float32)
    out_bf16 = mlp_forward(xb, params, tile_m=256, compute_dtype=jnp.bfloat16)
    jax.block_until_ready(out_bf16)
    assert out_bf16.shape == (512, output_dim)
    assert jnp.allclose(out_bf16, ref_forward(xb, params), atol=5e-2), "bf16 mismatch"

    print("KERNEL_OK")
</pallas_src>

<mosaic_0001>
module attributes {stable_mosaic.version = 11 : i64} {
  func.func @mlp_kernel(%arg0: i32, %arg1: memref<8x128xf32, #tpu.memory_space<vmem>>, %arg2: memref<128x128xf32, #tpu.memory_space<vmem>>, %arg3: memref<1x128xf32, #tpu.memory_space<vmem>>, %arg4: memref<128x128xf32, #tpu.memory_space<vmem>>, %arg5: memref<1x128xf32, #tpu.memory_space<vmem>>, %arg6: memref<128x128xf32, #tpu.memory_space<vmem>>, %arg7: memref<1x128xf32, #tpu.memory_space<vmem>>, %arg8: memref<128x128xf32, #tpu.memory_space<vmem>>, %arg9: memref<1x128xf32, #tpu.memory_space<vmem>>, %arg10: memref<8x128xf32, #tpu.memory_space<vmem>>) attributes {dimension_semantics = [#tpu.dimension_semantics<parallel>], iteration_bounds = array<i64: 1>, scalar_prefetch = 0 : i64, scratch_operands = 0 : i64, tpu.core_type = #tpu.core_type<tc>, window_params = [{transform_indices = @transform_0, window_bounds = array<i64: 8, 128>}, {pipeline_mode = #tpu.pipeline_mode<synchronous>, transform_indices = @transform_1, window_bounds = array<i64: 128, 128>}, {pipeline_mode = #tpu.pipeline_mode<synchronous>, transform_indices = @transform_2, window_bounds = array<i64: 1, 128>}, {pipeline_mode = #tpu.pipeline_mode<synchronous>, transform_indices = @transform_3, window_bounds = array<i64: 128, 128>}, {pipeline_mode = #tpu.pipeline_mode<synchronous>, transform_indices = @transform_4, window_bounds = array<i64: 1, 128>}, {pipeline_mode = #tpu.pipeline_mode<synchronous>, transform_indices = @transform_5, window_bounds = array<i64: 128, 128>}, {pipeline_mode = #tpu.pipeline_mode<synchronous>, transform_indices = @transform_6, window_bounds = array<i64: 1, 128>}, {pipeline_mode = #tpu.pipeline_mode<synchronous>, transform_indices = @transform_7, window_bounds = array<i64: 128, 128>}, {pipeline_mode = #tpu.pipeline_mode<synchronous>, transform_indices = @transform_8, window_bounds = array<i64: 1, 128>}, {transform_indices = @transform_9, window_bounds = array<i64: 8, 128>}]} {
    %c0 = arith.constant 0 : index
    %c0_0 = arith.constant 0 : index
    %0 = vector.load %arg1[%c0, %c0_0] : memref<8x128xf32, #tpu.memory_space<vmem>>, vector<8x128xf32>
    %c0_1 = arith.constant 0 : index
    %c0_2 = arith.constant 0 : index
    %1 = vector.load %arg2[%c0_1, %c0_2] : memref<128x128xf32, #tpu.memory_space<vmem>>, vector<128x128xf32>
    %cst = arith.constant dense<0.000000e+00> : vector<8x128xf32>
    %2 = tpu.matmul %0, %1, %cst {dimension_numbers = #tpu.dot_dimension_numbers<[1], [0], [0], [1], [0, 0, 1, 1], [], []>} : vector<8x128xf32>, vector<128x128xf32>, vector<8x128xf32> -> vector<8x128xf32>
    %c0_3 = arith.constant 0 : index
    %c0_4 = arith.constant 0 : index
    %3 = vector.load %arg3[%c0_3, %c0_4] : memref<1x128xf32, #tpu.memory_space<vmem>>, vector<1x128xf32>
    %4 = vector.broadcast %3 : vector<1x128xf32> to vector<8x128xf32>
    %5 = arith.addf %2, %4 : vector<8x128xf32>
    %cst_5 = arith.constant 0.000000e+00 : f32
    %6 = vector.broadcast %cst_5 : f32 to vector<8x128xf32>
    %7 = arith.maximumf %5, %6 : vector<8x128xf32>
    %c0_6 = arith.constant 0 : index
    %c0_7 = arith.constant 0 : index
    %8 = vector.load %arg4[%c0_6, %c0_7] : memref<128x128xf32, #tpu.memory_space<vmem>>, vector<128x128xf32>
    %cst_8 = arith.constant dense<0.000000e+00> : vector<8x128xf32>
    %9 = tpu.matmul %7, %8, %cst_8 {dimension_numbers = #tpu.dot_dimension_numbers<[1], [0], [0], [1], [0, 0, 1, 1], [], []>} : vector<8x128xf32>, vector<128x128xf32>, vector<8x128xf32> -> vector<8x128xf32>
    %c0_9 = arith.constant 0 : index
    %c0_10 = arith.constant 0 : index
    %10 = vector.load %arg5[%c0_9, %c0_10] : memref<1x128xf32, #tpu.memory_space<vmem>>, vector<1x128xf32>
    %11 = vector.broadcast %10 : vector<1x128xf32> to vector<8x128xf32>
    %12 = arith.addf %9, %11 : vector<8x128xf32>
    %cst_11 = arith.constant 0.000000e+00 : f32
    %13 = vector.broadcast %cst_11 : f32 to vector<8x128xf32>
    %14 = arith.maximumf %12, %13 : vector<8x128xf32>
    %c0_12 = arith.constant 0 : index
    %c0_13 = arith.constant 0 : index
    %15 = vector.load %arg6[%c0_12, %c0_13] : memref<128x128xf32, #tpu.memory_space<vmem>>, vector<128x128xf32>
    %cst_14 = arith.constant dense<0.000000e+00> : vector<8x128xf32>
    %16 = tpu.matmul %14, %15, %cst_14 {dimension_numbers = #tpu.dot_dimension_numbers<[1], [0], [0], [1], [0, 0, 1, 1], [], []>} : vector<8x128xf32>, vector<128x128xf32>, vector<8x128xf32> -> vector<8x128xf32>
    %c0_15 = arith.constant 0 : index
    %c0_16 = arith.constant 0 : index
    %17 = vector.load %arg7[%c0_15, %c0_16] : memref<1x128xf32, #tpu.memory_space<vmem>>, vector<1x128xf32>
    %18 = vector.broadcast %17 : vector<1x128xf32> to vector<8x128xf32>
    %19 = arith.addf %16, %18 : vector<8x128xf32>
    %cst_17 = arith.constant 0.000000e+00 : f32
    %20 = vector.broadcast %cst_17 : f32 to vector<8x128xf32>
    %21 = arith.maximumf %19, %20 : vector<8x128xf32>
    %c0_18 = arith.constant 0 : index
    %c0_19 = arith.constant 0 : index
    %22 = vector.load %arg8[%c0_18, %c0_19] : memref<128x128xf32, #tpu.memory_space<vmem>>, vector<128x128xf32>
    %cst_20 = arith.constant dense<0.000000e+00> : vector<8x128xf32>
    %23 = tpu.matmul %21, %22, %cst_20 {dimension_numbers = #tpu.dot_dimension_numbers<[1], [0], [0], [1], [0, 0, 1, 1], [], []>} : vector<8x128xf32>, vector<128x128xf32>, vector<8x128xf32> -> vector<8x128xf32>
    %c0_21 = arith.constant 0 : index
    %c0_22 = arith.constant 0 : index
    %24 = vector.load %arg9[%c0_21, %c0_22] : memref<1x128xf32, #tpu.memory_space<vmem>>, vector<1x128xf32>
    %25 = vector.broadcast %24 : vector<1x128xf32> to vector<8x128xf32>
    %26 = arith.addf %23, %25 : vector<8x128xf32>
    %27 = arith.negf %26 : vector<8x128xf32>
    %28 = math.exp %27 : vector<8x128xf32>
    %cst_23 = arith.constant 1.000000e+00 : f32
    %29 = vector.broadcast %cst_23 : f32 to vector<8x128xf32>
    %30 = arith.addf %29, %28 : vector<8x128xf32>
    %31 = arith.divf %29, %30 : vector<8x128xf32>
    %c0_24 = arith.constant 0 : index
    %c0_25 = arith.constant 0 : index
    %32 = vector.load %arg10[%c0_24, %c0_25] : memref<8x128xf32, #tpu.memory_space<vmem>>, vector<8x128xf32>
    tpu.vector_store %arg10[%c0_24, %c0_25], %31 {strides = array<i32>} : memref<8x128xf32, #tpu.memory_space<vmem>>, vector<8x128xf32>,
    return
  }
  func.func @transform_0(%arg0: i32) -> (i32, i32) {
    %c0_i32 = arith.constant 0 : i32
    %c0_i32_0 = arith.constant 0 : i32
    return %arg0, %c0_i32 : i32, i32
  }
  func.func @transform_1(%arg0: i32) -> (i32, i32) {
    %c0_i32 = arith.constant 0 : i32
    %c0_i32_0 = arith.constant 0 : i32
    %c0_i32_1 = arith.constant 0 : i32
    return %c0_i32, %c0_i32_0 : i32, i32
  }
  func.func @transform_2(%arg0: i32) -> (i32, i32) {
    %c0_i32 = arith.constant 0 : i32
    %c0_i32_0 = arith.constant 0 : i32
    %c0_i32_1 = arith.constant 0 : i32
    return %c0_i32, %c0_i32_0 : i32, i32
  }
  func.func @transform_3(%arg0: i32) -> (i32, i32) {
    %c0_i32 = arith.constant 0 : i32
    %c0_i32_0 = arith.constant 0 : i32
    %c0_i32_1 = arith.constant 0 : i32
    return %c0_i32, %c0_i32_0 : i32, i32
  }
  func.func @transform_4(%arg0: i32) -> (i32, i32) {
    %c0_i32 = arith.constant 0 : i32
    %c0_i32_0 = arith.constant 0 : i32
    %c0_i32_1 = arith.constant 0 : i32
    return %c0_i32, %c0_i32_0 : i32, i32
  }
  func.func @transform_5(%arg0: i32) -> (i32, i32) {
    %c0_i32 = arith.constant 0 : i32
    %c0_i32_0 = arith.constant 0 : i32
    %c0_i32_1 = arith.constant 0 : i32
    return %c0_i32, %c0_i32_0 : i32, i32
  }
  func.func @transform_6(%arg0: i32) -> (i32, i32) {
    %c0_i32 = arith.constant 0 : i32
    %c0_i32_0 = arith.constant 0 : i32
    %c0_i32_1 = arith.constant 0 : i32
    return %c0_i32, %c0_i32_0 : i32, i32
  }
  func.func @transform_7(%arg0: i32) -> (i32, i32) {
    %c0_i32 = arith.constant 0 : i32
    %c0_i32_0 = arith.constant 0 : i32
    %c0_i32_1 = arith.constant 0 : i32
    return %c0_i32, %c0_i32_0 : i32, i32
  }
  func.func @transform_8(%arg0: i32) -> (i32, i32) {
    %c0_i32 = arith.constant 0 : i32
    %c0_i32_0 = arith.constant 0 : i32
    %c0_i32_1 = arith.constant 0 : i32
    return %c0_i32, %c0_i32_0 : i32, i32
  }
  func.func @transform_9(%arg0: i32) -> (i32, i32) {
    %c0_i32 = arith.constant 0 : i32
    %c0_i32_0 = arith.constant 0 : i32
    return %arg0, %c0_i32 : i32, i32
  }
}

</mosaic_0001>

<bundles_post_ra>
// kernel: mlp_forward.1
= control target key start
LH: loop header
LB: loop body
LE: loop exit
PB: predicated region body
PF: predicated region fallthrough
CT: control target
= control target key end

     0   :  { %v638_v0 = vmov 0.0   ;;  %vm639_vm0 = vmmov 0   ;;  %s972_s1 = inlined_call_operand.vmem [shape: f32[128,128], index: 1, kind: input, shape index: {}]   ;;  %s973_s3 = inlined_call_operand.vmem [shape: f32[128,128], index: 3, kind: input, shape index: {}]   ;;  %s974_s0 = inlined_call_operand.vmem [shape: f32[8,128], index: 0, kind: input, shape index: {}]   ;;  %s975_s5 = inlined_call_operand.vmem [shape: f32[128,128], index: 5, kind: input, shape index: {}]   ;;  %s976_s2 = inlined_call_operand.vmem [shape: f32[1,128], index: 2, kind: input, shape index: {}]   ;;  %s977_s7 = inlined_call_operand.vmem [shape: f32[128,128], index: 7, kind: input, shape index: {}]   ;;  %s978_s4 = inlined_call_operand.vmem [shape: f32[1,128], index: 4, kind: input, shape index: {}]   ;;  %s979_s6 = inlined_call_operand.vmem [shape: f32[1,128], index: 6, kind: input, shape index: {}]   ;;  %s980_s8 = inlined_call_operand.vmem [shape: f32[1,128], index: 8, kind: input, shape index: {}]   ;;  %s981_s9 = inlined_call_operand.vmem [shape: f32[8,128], index: 9, kind: output, shape index: {}]  }
   0x1   :  { %492 = vmatprep.subr.mxu0 %v638_v0  ;;  %v48_v1 = vld [vmem:[%s972_s1 + $0x78] sm:$0xff]  ;;  %v47_v2 = vld [vmem:[%s972_s1 + $0x70] sm:$0xff]  ;;  %524 = vmatprep.mubr.msk.f32.mxu0 %vm639_vm0, %v638_v0  ;;  %v46_v3 = vld [vmem:[%s972_s1 + $0x68] sm:$0xff] }
   0x2   :  { %493 = vmatpush3.msra.mxu0 %v48_v1  ;;  %527 = vmatprep.subr.mxu1 %v638_v0  ;;  %v45_v4 = vld [vmem:[%s972_s1 + $0x60] sm:$0xff]  ;;  %v142_v5 = vld [vmem:[%s973_s3 + $0x78] sm:$0xff]  ;;  %v141_v7 = vld [vmem:[%s973_s3 + $0x70] sm:$0xff] }
   0x3   :  { %494 = vmatprep.subr.mxu0 %v638_v0  ;;  %559 = vmatprep.mubr.msk.f32.mxu1 %vm639_vm0, %v638_v0  ;;  %v44_v6 = vld [vmem:[%s972_s1 + $0x58] sm:$0xff]  ;;  %v140_v8 = vld [vmem:[%s973_s3 + $0x68] sm:$0xff]  ;;  %v43_v9 = vld [vmem:[%s972_s1 + $0x50] sm:$0xff] }
   0x4   :  { %495 = vmatpush3.msra.mxu0 %v47_v2  ;;  %528 = vmatpush3.msra.mxu1 %v142_v5  ;;  %v139_v10 = vld [vmem:[%s973_s3 + $0x60] sm:$0xff]  ;;  %v42_v11 = vld [vmem:[%s972_s1 + $0x48] sm:$0xff]  ;;  %v138_v12 = vld [vmem:[%s973_s3 + $0x58] sm:$0xff] }
   0x5   :  { %496 = vmatprep.subr.mxu0 %v638_v0  ;;  %529 = vmatprep.subr.mxu1 %v638_v0  ;;  %v41_v13 = vld [vmem:[%s972_s1 + $0x40] sm:$0xff]  ;;  %v137_v14 = vld [vmem:[%s973_s3 + $0x50] sm:$0xff]  ;;  %v40_v15 = vld [vmem:[%s972_s1 + $0x38] sm:$0xff] }
   0x6   :  { %497 = vmatpush3.msra.mxu0 %v46_v3  ;;  %530 = vmatpush3.msra.mxu1 %v141_v7  ;;  %v136_v16 = vld [vmem:[%s973_s3 + $0x48] sm:$0xff]  ;;  %v39_v17 = vld [vmem:[%s972_s1 + $0x30] sm:$0xff]  ;;  %v135_v18 = vld [vmem:[%s973_s3 + $0x40] sm:$0xff] }
   0x7   :  { %498 = vmatprep.subr.mxu0 %v638_v0  ;;  %531 = vmatprep.subr.mxu1 %v638_v0  ;;  %v38_v19 = vld [vmem:[%s972_s1 + $0x28] sm:$0xff]  ;;  %v134_v20 = vld [vmem:[%s973_s3 + $0x38] sm:$0xff]  ;;  %v37_v21 = vld [vmem:[%s972_s1 + $0x20] sm:$0xff] }
   0x8   :  { %499 = vmatpush3.msra.mxu0 %v45_v4  ;;  %532 = vmatpush3.msra.mxu1 %v140_v8  ;;  %v133_v22 = vld [vmem:[%s973_s3 + $0x30] sm:$0xff]  ;;  %v36_v23 = vld [vmem:[%s972_s1 + $0x18] sm:$0xff]  ;;  %v132_v24 = vld [vmem:[%s973_s3 + $0x28] sm:$0xff] }
   0x9   :  { %500 = vmatprep.subr.mxu0 %v638_v0  ;;  %533 = vmatprep.subr.mxu1 %v638_v0  ;;  %v35_v25 = vld [vmem:[%s972_s1 + $0x10] sm:$0xff]  ;;  %v131_v26 = vld [vmem:[%s973_s3 + $0x20] sm:$0xff]  ;;  %v34_v27 = vld [vmem:[%s972_s1 + $0x8] sm:$0xff] }
   0xa   :  { %501 = vmatpush3.msra.mxu0 %v44_v6  ;;  %534 = vmatpush3.msra.mxu1 %v139_v10  ;;  %v130_v28 = vld [vmem:[%s973_s3 + $0x18] sm:$0xff]  ;;  %v33_v29 = vld [vmem:[%s972_s1] sm:$0xff]  ;;  %v129_v31 = vld [vmem:[%s973_s3 + $0x10] sm:$0xff] }
   0xb   :  { %502 = vmatprep.subr.mxu0 %v638_v0  ;;  %535 = vmatprep.subr.mxu1 %v638_v0  ;;  %v32_v30 = vld [vmem:[%s974_s0] sm:$0xff]  ;;  %v128_v32 = vld [vmem:[%s973_s3 + $0x8] sm:$0xff]  ;;  %v236_v34 = vld [vmem:[%s975_s5 + $0x78] sm:$0xff] }
   0xc   :  { %503 = vmatpush3.msra.mxu0 %v43_v9  ;;  %536 = vmatpush3.msra.mxu1 %v138_v12  ;;  %v127_v33 = vld [vmem:[%s973_s3] sm:$0xff]  ;;  %v235_v35 = vld [vmem:[%s975_s5 + $0x70] sm:$0xff]  ;;  %v234_v36 = vld [vmem:[%s975_s5 + $0x68] sm:$0xff] }
   0xd   :  { %504 = vmatprep.subr.mxu0 %v638_v0  ;;  %537 = vmatprep.subr.mxu1 %v638_v0  ;;  %v233_v37 = vld [vmem:[%s975_s5 + $0x60] sm:$0xff]  ;;  %v232_v38 = vld [vmem:[%s975_s5 + $0x58] sm:$0xff]  ;;  %v231_v39 = vld [vmem:[%s975_s5 + $0x50] sm:$0xff] }
   0xe   :  { %505 = vmatpush3.msra.mxu0 %v42_v11  ;;  %538 = vmatpush3.msra.mxu1 %v137_v14  ;;  %v230_v40 = vld [vmem:[%s975_s5 + $0x48] sm:$0xff]  ;;  %v229_v41 = vld [vmem:[%s975_s5 + $0x40] sm:$0xff]  ;;  %v228_v42 = vld [vmem:[%s975_s5 + $0x38] sm:$0xff] }
   0xf   :  { %506 = vmatprep.subr.mxu0 %v638_v0  ;;  %539 = vmatprep.subr.mxu1 %v638_v0  ;;  %v227_v43 = vld [vmem:[%s975_s5 + $0x30] sm:$0xff]  ;;  %v226_v44 = vld [vmem:[%s975_s5 + $0x28] sm:$0xff]  ;;  %v225_v45 = vld [vmem:[%s975_s5 + $0x20] sm:$0xff] }
  0x10   :  { %507 = vmatpush3.msra.mxu0 %v41_v13  ;;  %540 = vmatpush3.msra.mxu1 %v136_v16  ;;  %v224_v46 = vld [vmem:[%s975_s5 + $0x18] sm:$0xff]  ;;  %v419_v47 = vld [vmem:[%s976_s2] ss:$0 sm:$0xff]  ;;  %v223_v52 = vld [vmem:[%s975_s5 + $0x10] sm:$0xff] }
  0x11   :  { %508 = vmatprep.subr.mxu0 %v638_v0  ;;  %541 = vmatprep.subr.mxu1 %v638_v0  ;;  %v222_v53 = vld [vmem:[%s975_s5 + $0x8] sm:$0xff]  ;;  %v221_v54 = vld [vmem:[%s975_s5] sm:$0xff]  ;;  %v330_v55 = vld [vmem:[%s977_s7 + $0x78] sm:$0xff] }
  0x12   :  { %509 = vmatpush3.msra.mxu0 %v40_v15  ;;  %542 = vmatpush3.msra.mxu1 %v135_v18  ;;  %v329_v56 = vld [vmem:[%s977_s7 + $0x70] sm:$0xff]  ;;  %v328_v57 = vld [vmem:[%s977_s7 + $0x68] sm:$0xff]  ;;  %v327_v58 = vld [vmem:[%s977_s7 + $0x60] sm:$0xff] }
  0x13   :  { %510 = vmatprep.subr.mxu0 %v638_v0  ;;  %543 = vmatprep.subr.mxu1 %v638_v0  ;;  %v326_v59 = vld [vmem:[%s977_s7 + $0x58] sm:$0xff]  ;;  %v325_v60 = vld [vmem:[%s977_s7 + $0x50] sm:$0xff]  ;;  %v324_v61 = vld [vmem:[%s977_s7 + $0x48] sm:$0xff] }
  0x14   :  { %511 = vmatpush3.msra.mxu0 %v39_v17  ;;  %544 = vmatpush3.msra.mxu1 %v134_v20  ;;  %v323_v62 = vld [vmem:[%s977_s7 + $0x40] sm:$0xff]  ;;  %v322_v63 = vld [vmem:[%s977_s7 + $0x38] sm:$0xff]  ;;  %v321_v1 = vld [vmem:[%s977_s7 + $0x30] sm:$0xff] }
  0x15   :  { %512 = vmatprep.subr.mxu0 %v638_v0  ;;  %545 = vmatprep.subr.mxu1 %v638_v0  ;;  %v320_v2 = vld [vmem:[%s977_s7 + $0x28] sm:$0xff]  ;;  %v319_v3 = vld [vmem:[%s977_s7 + $0x20] sm:$0xff]  ;;  %v318_v4 = vld [vmem:[%s977_s7 + $0x18] sm:$0xff] }
  0x16   :  { %513 = vmatpush3.msra.mxu0 %v38_v19  ;;  %546 = vmatpush3.msra.mxu1 %v133_v22  ;;  %v420_v5 = vld [vmem:[%s978_s4] ss:$0 sm:$0xff]  ;;  %v317_v10 = vld [vmem:[%s977_s7 + $0x10] sm:$0xff]  ;;  %v316_v11 = vld [vmem:[%s977_s7 + $0x8] sm:$0xff] }
  0x17   :  { %514 = vmatprep.subr.mxu0 %v638_v0  ;;  %547 = vmatprep.subr.mxu1 %v638_v0  ;;  %v315_v12 = vld [vmem:[%s977_s7] sm:$0xff] }
  0x18   :  { %515 = vmatpush3.msra.mxu0 %v37_v21  ;;  %548 = vmatpush3.msra.mxu1 %v132_v24  ;;  %v421_v13 = vld [vmem:[%s979_s6] ss:$0 sm:$0xff] }
  0x19   :  { %516 = vmatprep.subr.mxu0 %v638_v0  ;;  %549 = vmatprep.subr.mxu1 %v638_v0  ;;  %v422_v18 = vld [vmem:[%s980_s8] ss:$0 sm:$0xff] }
  0x1a   :  { %517 = vmatpush3.msra.mxu0 %v36_v23  ;;  %550 = vmatpush3.msra.mxu1 %v131_v26 }
  0x1b   :  { %518 = vmatprep.subr.mxu0 %v638_v0  ;;  %551 = vmatprep.subr.mxu1 %v638_v0 }
  0x1c   :  { %519 = vmatpush3.msra.mxu0 %v35_v25  ;;  %552 = vmatpush3.msra.mxu1 %v130_v28 }
  0x1d   :  { %520 = vmatprep.subr.mxu0 %v638_v0  ;;  %553 = vmatprep.subr.mxu1 %v638_v0 }
  0x1e   :  { %521 = vmatpush3.msra.mxu0 %v34_v27  ;;  %554 = vmatpush3.msra.mxu1 %v129_v31 }
  0x1f   :  { %522 = vmatprep.subr.mxu0 %v638_v0  ;;  %555 = vmatprep.subr.mxu1 %v638_v0 }
  0x20   :  { %523 = vmatpush3.msra.mxu0 %v33_v29  ;;  %556 = vmatpush3.msra.mxu1 %v128_v32 }
  0x21   :  { %525 = vmatmul.mubr.f32.vlgmr.msra.gmra.mxu0 %v32_v30  ;;  %562 = vmatprep.subr.mxu0 %v638_v0 }
  0x22   :  { %594 = vmatprep.mubr.msk.f32.mxu0 %vm639_vm0, %v638_v0  ;;  %557 = vmatprep.subr.mxu1 %v638_v0 }
  0x23   :  { %558 = vmatpush3.msra.mxu1 %v127_v33  ;;  %563 = vmatpush3.msra.mxu0 %v236_v34 }
  0x24   :  { %597 = vmatprep.subr.mxu1 %v638_v0  ;;  %564 = vmatprep.subr.mxu0 %v638_v0 }
  0x25   :  { %565 = vmatpush3.msra.mxu0 %v235_v35 }
  0x26   :  { %566 = vmatprep.subr.mxu0 %v638_v0 }
  0x27   :  { %567 = vmatpush3.msra.mxu0 %v234_v36 }
  0x28   :  { %568 = vmatprep.subr.mxu0 %v638_v0 }
  0x29   :  { %569 = vmatpush3.msra.mxu0 %v233_v37 }
  0x2a   :  { %570 = vmatprep.subr.mxu0 %v638_v0 }
  0x2b   :  { %571 = vmatpush3.msra.mxu0 %v232_v38 }
  0x2c   :  { %572 = vmatprep.subr.mxu0 %v638_v0 }
  0x2d   :  { %573 = vmatpush3.msra.mxu0 %v231_v39 }
  0x2e   :  { %574 = vmatprep.subr.mxu0 %v638_v0 }
  0x2f   :  { %575 = vmatpush3.msra.mxu0 %v230_v40 }
  0x30   :  { %576 = vmatprep.subr.mxu0 %v638_v0 }
  0x31   :  { %577 = vmatpush3.msra.mxu0 %v229_v41 }
  0x32   :  { %578 = vmatprep.subr.mxu0 %v638_v0 }
  0x33   :  { %579 = vmatpush3.msra.mxu0 %v228_v42 }
  0x34   :  { %580 = vmatprep.subr.mxu0 %v638_v0 }
  0x35   :  { %581 = vmatpush3.msra.mxu0 %v227_v43 }
  0x36   :  { %582 = vmatprep.subr.mxu0 %v638_v0 }
  0x37   :  { %583 = vmatpush3.msra.mxu0 %v226_v44 }
  0x38   :  { %584 = vmatprep.subr.mxu0 %v638_v0 }
  0x39   :  { %585 = vmatpush3.msra.mxu0 %v225_v45 }
  0x3a   :  { %586 = vmatprep.subr.mxu0 %v638_v0 }
  0x3b   :  { %587 = vmatpush3.msra.mxu0 %v224_v46 }
  0x3c   :  { %588 = vmatprep.subr.mxu0 %v638_v0 }
  0x3d   :  { %589 = vmatpush3.msra.mxu0 %v223_v52 }
  0x3e   :  { %590 = vmatprep.subr.mxu0 %v638_v0 }
  0x3f   :  { %591 = vmatpush3.msra.mxu0 %v222_v53 }
  0x40   :  { %592 = vmatprep.subr.mxu0 %v638_v0 }
  0x41   :  { %593 = vmatpush3.msra.mxu0 %v221_v54 }
  0xe1   :  { %v122_v48 = vpop.f32.mrf.mxu0 }
  0xe2   :  { %v123_v49 = vadd.f32 %v419_v47, %v122_v48 }
  0xe3   :  { %v526_v50 = vpop.f32.mrf.mxu0 }
  0xe4   :  { %v126_v51 = vmax.f32 %v123_v49, 0.0 }
  0xe6   :  { %560 = vmatmul.mubr.f32.vlgmr.msra.gmra.mxu1 %v126_v51 }
  0xe7   :  { %629 = vmatprep.mubr.msk.f32.mxu1 %vm639_vm0, %v638_v0  ;;  %598 = vmatpush3.msra.mxu1 %v330_v55 }
  0xe8   :  { %599 = vmatprep.subr.mxu1 %v638_v0 }
  0xe9   :  { %600 = vmatpush3.msra.mxu1 %v329_v56 }
  0xea   :  { %601 = vmatprep.subr.mxu1 %v638_v0 }
  0xeb   :  { %602 = vmatpush3.msra.mxu1 %v328_v57 }
  0xec   :  { %603 = vmatprep.subr.mxu1 %v638_v0 }
  0xed   :  { %604 = vmatpush3.msra.mxu1 %v327_v58 }
  0xee   :  { %605 = vmatprep.subr.mxu1 %v638_v0 }
  0xef   :  { %606 = vmatpush3.msra.mxu1 %v326_v59 }
  0xf0   :  { %607 = vmatprep.subr.mxu1 %v638_v0 }
  0xf1   :  { %608 = vmatpush3.msra.mxu1 %v325_v60 }
  0xf2   :  { %609 = vmatprep.subr.mxu1 %v638_v0 }
  0xf3   :  { %610 = vmatpush3.msra.mxu1 %v324_v61 }
  0xf4   :  { %611 = vmatprep.subr.mxu1 %v638_v0 }
  0xf5   :  { %612 = vmatpush3.msra.mxu1 %v323_v62 }
  0xf6   :  { %613 = vmatprep.subr.mxu1 %v638_v0 }
  0xf7   :  { %614 = vmatpush3.msra.mxu1 %v322_v63 }
  0xf8   :  { %615 = vmatprep.subr.mxu1 %v638_v0 }
  0xf9   :  { %616 = vmatpush3.msra.mxu1 %v321_v1 }
  0xfa   :  { %617 = vmatprep.subr.mxu1 %v638_v0 }
  0xfb   :  { %618 = vmatpush3.msra.mxu1 %v320_v2 }
  0xfc   :  { %619 = vmatprep.subr.mxu1 %v638_v0 }
  0xfd   :  { %620 = vmatpush3.msra.mxu1 %v319_v3 }
  0xfe   :  { %621 = vmatprep.subr.mxu1 %v638_v0 }
  0xff   :  { %622 = vmatpush3.msra.mxu1 %v318_v4 }
 0x100   :  { %623 = vmatprep.subr.mxu1 %v638_v0 }
 0x101   :  { %624 = vmatpush3.msra.mxu1 %v317_v10 }
 0x102   :  { %625 = vmatprep.subr.mxu1 %v638_v0 }
 0x103   :  { %626 = vmatpush3.msra.mxu1 %v316_v11 }
 0x104   :  { %627 = vmatprep.subr.mxu1 %v638_v0 }
 0x105   :  { %628 = vmatpush3.msra.mxu1 %v315_v12 }
 0x1a6   :  { %v216_v6 = vpop.f32.mrf.mxu1 }
 0x1a7   :  { %v217_v7 = vadd.f32 %v420_v5, %v216_v6 }
 0x1a8   :  { %v561_v8 = vpop.f32.mrf.mxu1 }
 0x1a9   :  { %v220_v9 = vmax.f32 %v217_v7, 0.0 }
 0x1ab   :  { %595 = vmatmul.mubr.f32.vlgmr.msra.gmra.mxu0 %v220_v9 }
 0x26b   :  { %v310_v14 = vpop.f32.mrf.mxu0 }
 0x26c   :  { %v311_v15 = vadd.f32 %v421_v13, %v310_v14 }
 0x26d   :  { %v596_v16 = vpop.f32.mrf.mxu0 }
 0x26e   :  { %v314_v17 = vmax.f32 %v311_v15, 0.0 }
 0x270   :  { %630 = vmatmul.mubr.f32.vlgmr.msra.gmra.mxu1 %v314_v17 }
 0x330   :  { %v404_v19 = vpop.f32.mrf.mxu1 }
 0x331   :  { %v405_v0 = vadd.f32 %v422_v18, %v404_v19 }
 0x332   :  { %v631_v20 = vpop.f32.mrf.mxu1 }
 0x333   :  { %v423_v21 = vmul.f32 -1.442695, %v405_v0 }
 0x335   :  { %634 = vpow2.f32 %v423_v21 }
 0x342   :  { %v635_v22 = vpop.eup %634 }
 0x343   :  { %v411_v23 = vadd.f32 1.0, %v635_v22 }
 0x345   :  { %636 = vrcp.f32 %v411_v23 }
 0x352   :  { %v637_v24 = vpop.eup %636 }
 0x353   :  { %414 = vst [vmem:[%s981_s9] sm:$0xff] %v637_v24 }

</bundles_post_ra>
